<compile_context>
chip_gen: v7x
topology: tpu7x:2x2x1
jax: 0.10.0
libtpu: 0.0.40
codegen_flags: <defaults>
</compile_context>

<pallas_src>
import numpy as np
import jax
import jax.numpy as jnp
from jax.experimental import pallas as pl
from jax.experimental.pallas import tpu as pltpu

LANE = 128
MAX_BLOCK_ROWS = 1024        # (1024, 128) f32 block = 512 KiB per input
NUM_CORE_SPLITS = 2          # megacore split on v7x; harmless on 1-TC chips


def _make_raf_kernel(n_valid, blk_rows, blocks_per_core, needs_mask):
    """Build the kernel with static shape/config baked in via closure."""

    def kernel(pred_ref, gt_ref, w_ref,
               sw_ref, npos_ref, sneg_ref, cneg_ref):
        c = pl.program_id(0)     # core-split ("parallel") axis
        i = pl.program_id(1)     # reduction ("arbitrary") axis

        # Output blocks are resident across the reduction axis -> accumulators.
        @pl.when(i == 0)
        def _():
            sw_ref[...] = jnp.zeros_like(sw_ref)
            npos_ref[...] = jnp.zeros_like(npos_ref)
            sneg_ref[...] = jnp.zeros_like(sneg_ref)
            cneg_ref[...] = jnp.zeros_like(cneg_ref)

        p = pred_ref[...].astype(jnp.float32)
        g = gt_ref[...].astype(jnp.float32)
        w = w_ref[...].astype(jnp.float32)

        diff = jnp.abs(p - g)                 # L1, reduction='none'
        pos = (w == 1.0)                      # weights.eq(1)
        neg = (w == 0.0)                      # neg_mask = weights == 0

        if needs_mask:
            # Mask the ragged tail / padded lanes / duplicate clamped blocks.
            row = jax.lax.broadcasted_iota(jnp.int32, (blk_rows, LANE), 0)
            lane = jax.lax.broadcasted_iota(jnp.int32, (blk_rows, LANE), 1)
            gblk = c * blocks_per_core + i            # unclamped global block id
            gidx = (gblk * blk_rows + row) * LANE + lane
            valid = gidx < n_valid
            pos = jnp.logical_and(valid, pos)
            neg = jnp.logical_and(valid, neg)
            dw = jnp.where(valid, diff * w, 0.0)      # select, no NaN leak
        else:
            dw = diff * w

        dn = jnp.where(neg, diff, 0.0)
        posf = pos.astype(jnp.float32)
        negf = neg.astype(jnp.float32)

        # Per-lane partial sums (sublane/vreg reduce only); cross-lane reduce
        # happens once in the wrapper.
        sw_ref[0] += jnp.sum(dw, axis=0, keepdims=True)
        npos_ref[0] += jnp.sum(posf, axis=0, keepdims=True)
        sneg_ref[0] += jnp.sum(dn, axis=0, keepdims=True)
        cneg_ref[0] += jnp.sum(negf, axis=0, keepdims=True)

    return kernel


def raf_loss(preds, gt_rafs, gt_raf_weights,
             loss_weight=1.0, neg_loss_weight=0.1, reg_area='all'):
    """Pallas RAFLoss.forward for raf_type='vector', l1, reg_area='all'."""
    gt = jnp.asarray(gt_rafs)
    p = jnp.asarray(preds)
    w = jnp.asarray(gt_raf_weights)
    assert p.size == gt.size == w.size and gt.size > 0

    n = gt.size
    pad = (-n) % LANE

    def to_rows(x):
        xf = x.reshape(-1)                  # free reshape (contiguous)
        if pad:
            # Rare misaligned fallback only; values are masked in-kernel.
            xf = jnp.pad(xf, (0, pad))
        return xf.reshape(-1, LANE)         # lane-dense [R, 128] view

    p2, g2, w2 = to_rows(p), to_rows(gt), to_rows(w)
    rows = p2.shape[0]

    blk_rows = rows if rows <= MAX_BLOCK_ROWS else MAX_BLOCK_ROWS
    n_blocks = pl.cdiv(rows, blk_rows)
    bpc = pl.cdiv(n_blocks, NUM_CORE_SPLITS)      # blocks per core
    # Mask needed iff the (core, block) grid over-covers the true element count
    # (padded lanes, partial last block, or duplicate clamped blocks).
    needs_mask = (NUM_CORE_SPLITS * bpc * blk_rows * LANE) != n

    def in_map(c, i):
        # Clamp so a trailing duplicate block re-reads valid data (masked out).
        return (jnp.minimum(c * bpc + i, n_blocks - 1), 0)

    def out_map(c, i):
        return (c, 0, 0)

    part_shape = jax.ShapeDtypeStruct((NUM_CORE_SPLITS, 1, LANE), jnp.float32)
    kernel = _make_raf_kernel(n, blk_rows, bpc, needs_mask)

    sw_p, npos_p, sneg_p, cneg_p = pl.pallas_call(
        kernel,
        out_shape=(part_shape, part_shape, part_shape, part_shape),
        grid_spec=pltpu.PrefetchScalarGridSpec(
            num_scalar_prefetch=0,
            grid=(NUM_CORE_SPLITS, bpc),
            in_specs=[
                pl.BlockSpec((blk_rows, LANE), in_map),
                pl.BlockSpec((blk_rows, LANE), in_map),
                pl.BlockSpec((blk_rows, LANE), in_map),
            ],
            out_specs=[pl.BlockSpec((1, 1, LANE), out_map)] * 4,
        ),
        compiler_params=pltpu.CompilerParams(
            dimension_semantics=("parallel", "arbitrary")),
    )(p2, g2, w2)

    sum_w = jnp.sum(sw_p)
    num_pos = jnp.sum(npos_p)
    sum_neg = jnp.sum(sneg_p)
    cnt_neg = jnp.sum(cneg_p)

    # _reg_loss: num = weights.eq(1).sum().clamp(min=1); loss = (l1*w).sum()/num
    loss = sum_w / jnp.maximum(num_pos, 1.0) * loss_weight

    if reg_area == 'all':
        # F.l1_loss(preds[neg_mask], gt_rafs[neg_mask], reduction='mean')
        # (empty neg mask -> NaN, matching the torch behavior)
        loss = loss + (sum_neg / cnt_neg) * neg_loss_weight
    # TODO(synk): reg_area == 'neg' (spatial max-over-predicate mask),
    # class_balance='cb', cos_similar, and raf_type='point' branches are not
    # wired for this config; only the 'vector'/l1/'all' path is exercised.
    return loss


def raf_loss_ref(preds, gt_rafs, gt_raf_weights,
                 loss_weight=1.0, neg_loss_weight=0.1):
    """Pure-JAX reference mirroring the PyTorch forward (vector / l1 / 'all')."""
    gt = jnp.asarray(gt_rafs, jnp.float32)
    p = jnp.asarray(preds, jnp.float32).reshape(gt.shape)
    w = jnp.asarray(gt_raf_weights, jnp.float32)
    diff = jnp.abs(p - gt)
    num = jnp.maximum(jnp.sum((w == 1.0).astype(jnp.float32)), 1.0)
    loss = jnp.sum(diff * w) / num * loss_weight
    neg = (w == 0.0).astype(jnp.float32)
    loss = loss + jnp.sum(diff * neg) / jnp.sum(neg) * neg_loss_weight
    return loss


if __name__ == "__main__":
    key = jax.random.PRNGKey(0)

    def run_case(B, P, V, H, W, case_key):
        k1, k2, k3 = jax.random.split(case_key, 3)
        # Network prediction is NCHW-like [B, P*2, H, W]; reshaped to gt shape.
        preds = jax.random.normal(k1, (B, P * V, H, W), jnp.float32) * 0.5
        gt_rafs = jax.random.normal(k2, (B, P, V, H, W), jnp.float32) * 0.5
        # Weights: exact 1.0 in positive regions, exact 0.0 over most of the
        # map, fractional elsewhere (as produced by the dataset mapper).
        u = jax.random.uniform(k3, (B, P, V, H, W), jnp.float32)
        gt_raf_weights = jnp.where(u > 0.85, 1.0, jnp.where(u < 0.6, 0.0, u))

        out = jax.block_until_ready(
            raf_loss(preds, gt_rafs, gt_raf_weights, 1.0, 0.1, 'all'))
        ref = jax.block_until_ready(
            raf_loss_ref(preds, gt_rafs, gt_raf_weights, 1.0, 0.1))
        assert np.isfinite(np.asarray(out)), f"non-finite loss: {out}"
        np.testing.assert_allclose(np.asarray(out), np.asarray(ref),
                                   rtol=1e-5, atol=1e-6)

    k1, k2 = jax.random.split(key)
    # Lane-aligned case (zero-copy reshape path): B=2, P=4, 2 comps, 16x16.
    run_case(2, 4, 2, 16, 16, k1)
    # Ragged case (pad fallback + in-kernel masking + clamped duplicate block).
    run_case(2, 4, 2, 13, 13, k2)
    print("KERNEL_OK")
</pallas_src>

<mosaic_0001>
module attributes {stable_mosaic.version = 11 : i64} {
  func.func @kernel(%arg0: i32, %arg1: i32, %arg2: memref<32x128xf32, #tpu.memory_space<vmem>>, %arg3: memref<32x128xf32, #tpu.memory_space<vmem>>, %arg4: memref<32x128xf32, #tpu.memory_space<vmem>>, %arg5: memref<1x1x128xf32, #tpu.memory_space<vmem>>, %arg6: memref<1x1x128xf32, #tpu.memory_space<vmem>>, %arg7: memref<1x1x128xf32, #tpu.memory_space<vmem>>, %arg8: memref<1x1x128xf32, #tpu.memory_space<vmem>>) attributes {dimension_semantics = [#tpu.dimension_semantics<parallel>, #tpu.dimension_semantics<arbitrary>], iteration_bounds = array<i64: 2, 1>, scalar_prefetch = 0 : i64, scratch_operands = 0 : i64, tpu.core_type = #tpu.core_type<tc>, window_params = [{transform_indices = @transform_0, window_bounds = array<i64: 32, 128>}, {transform_indices = @transform_1, window_bounds = array<i64: 32, 128>}, {transform_indices = @transform_2, window_bounds = array<i64: 32, 128>}, {transform_indices = @transform_3, window_bounds = array<i64: 1, 1, 128>}, {transform_indices = @transform_4, window_bounds = array<i64: 1, 1, 128>}, {transform_indices = @transform_5, window_bounds = array<i64: 1, 1, 128>}, {transform_indices = @transform_6, window_bounds = array<i64: 1, 1, 128>}]} {
    %c0_i32 = arith.constant 0 : i32
    %0 = arith.cmpi eq, %arg1, %c0_i32 : i32
    %1 = arith.extui %0 : i1 to i32
    %c0_i32_0 = arith.constant 0 : i32
    %2 = arith.cmpi ne, %1, %c0_i32_0 : i32
    scf.if %2 {
      %cst_37 = arith.constant 0.000000e+00 : f32
      %67 = vector.broadcast %cst_37 : f32 to vector<1x1x128xf32>
      %c0_38 = arith.constant 0 : index
      %c0_39 = arith.constant 0 : index
      %c0_40 = arith.constant 0 : index
      %68 = vector.load %arg5[%c0_38, %c0_39, %c0_40] : memref<1x1x128xf32, #tpu.memory_space<vmem>>, vector<1x1x128xf32>
      tpu.vector_store %arg5[%c0_38, %c0_39, %c0_40], %67 {strides = array<i32>} : memref<1x1x128xf32, #tpu.memory_space<vmem>>, vector<1x1x128xf32>,
      %cst_41 = arith.constant 0.000000e+00 : f32
      %69 = vector.broadcast %cst_41 : f32 to vector<1x1x128xf32>
      %c0_42 = arith.constant 0 : index
      %c0_43 = arith.constant 0 : index
      %c0_44 = arith.constant 0 : index
      %70 = vector.load %arg6[%c0_42, %c0_43, %c0_44] : memref<1x1x128xf32, #tpu.memory_space<vmem>>, vector<1x1x128xf32>
      tpu.vector_store %arg6[%c0_42, %c0_43, %c0_44], %69 {strides = array<i32>} : memref<1x1x128xf32, #tpu.memory_space<vmem>>, vector<1x1x128xf32>,
      %cst_45 = arith.constant 0.000000e+00 : f32
      %71 = vector.broadcast %cst_45 : f32 to vector<1x1x128xf32>
      %c0_46 = arith.constant 0 : index
      %c0_47 = arith.constant 0 : index
      %c0_48 = arith.constant 0 : index
      %72 = vector.load %arg7[%c0_46, %c0_47, %c0_48] : memref<1x1x128xf32, #tpu.memory_space<vmem>>, vector<1x1x128xf32>
      tpu.vector_store %arg7[%c0_46, %c0_47, %c0_48], %71 {strides = array<i32>} : memref<1x1x128xf32, #tpu.memory_space<vmem>>, vector<1x1x128xf32>,
      %cst_49 = arith.constant 0.000000e+00 : f32
      %73 = vector.broadcast %cst_49 : f32 to vector<1x1x128xf32>
      %c0_50 = arith.constant 0 : index
      %c0_51 = arith.constant 0 : index
      %c0_52 = arith.constant 0 : index
      %74 = vector.load %arg8[%c0_50, %c0_51, %c0_52] : memref<1x1x128xf32, #tpu.memory_space<vmem>>, vector<1x1x128xf32>
      tpu.vector_store %arg8[%c0_50, %c0_51, %c0_52], %73 {strides = array<i32>} : memref<1x1x128xf32, #tpu.memory_space<vmem>>, vector<1x1x128xf32>,
    } else {
    }
    %c0 = arith.constant 0 : index
    %c0_1 = arith.constant 0 : index
    %3 = vector.load %arg2[%c0, %c0_1] : memref<32x128xf32, #tpu.memory_space<vmem>>, vector<32x128xf32>
    %c0_2 = arith.constant 0 : index
    %c0_3 = arith.constant 0 : index
    %4 = vector.load %arg3[%c0_2, %c0_3] : memref<32x128xf32, #tpu.memory_space<vmem>>, vector<32x128xf32>
    %c0_4 = arith.constant 0 : index
    %c0_5 = arith.constant 0 : index
    %5 = vector.load %arg4[%c0_4, %c0_5] : memref<32x128xf32, #tpu.memory_space<vmem>>, vector<32x128xf32>
    %6 = arith.subf %3, %4 : vector<32x128xf32>
    %7 = math.absf %6 : vector<32x128xf32>
    %cst = arith.constant 1.000000e+00 : f32
    %8 = vector.broadcast %cst : f32 to vector<32x128xf32>
    %9 = arith.cmpf oeq, %5, %8 : vector<32x128xf32>
    %cst_6 = arith.constant 0.000000e+00 : f32
    %10 = vector.broadcast %cst_6 : f32 to vector<32x128xf32>
    %11 = arith.cmpf oeq, %5, %10 : vector<32x128xf32>
    %12 = tpu.iota {dimensions = array<i32: 0>} : vector<32x128xi32>
    %13 = tpu.iota {dimensions = array<i32: 1>} : vector<32x128xi32>
    %c1_i32 = arith.constant 1 : i32
    %14 = arith.muli %arg0, %c1_i32 : i32
    %15 = arith.addi %14, %arg1 : i32
    %c32_i32 = arith.constant 32 : i32
    %16 = arith.muli %15, %c32_i32 : i32
    %17 = vector.broadcast %16 : i32 to vector<32x128xi32>
    %18 = arith.addi %17, %12 : vector<32x128xi32>
    %c128_i32 = arith.constant 128 : i32
    %19 = vector.broadcast %c128_i32 : i32 to vector<32x128xi32>
    %20 = arith.muli %18, %19 : vector<32x128xi32>
    %21 = arith.addi %20, %13 : vector<32x128xi32>
    %c4096_i32 = arith.constant 4096 : i32
    %22 = vector.broadcast %c4096_i32 : i32 to vector<32x128xi32>
    %23 = arith.cmpi slt, %21, %22 : vector<32x128xi32>
    %24 = arith.andi %23, %9 : vector<32x128xi1>
    %25 = arith.andi %23, %11 : vector<32x128xi1>
    %26 = arith.mulf %7, %5 : vector<32x128xf32>
    %cst_7 = arith.constant 0.000000e+00 : f32
    %27 = vector.broadcast %cst_7 : f32 to vector<32x128xf32>
    %28 = arith.select %23, %26, %27 : vector<32x128xi1>, vector<32x128xf32>
    %cst_8 = arith.constant 0.000000e+00 : f32
    %29 = vector.broadcast %cst_8 : f32 to vector<32x128xf32>
    %30 = arith.select %25, %7, %29 : vector<32x128xi1>, vector<32x128xf32>
    %31 = arith.extui %24 : vector<32x128xi1> to vector<32x128xi32>
    %32 = arith.sitofp %31 : vector<32x128xi32> to vector<32x128xf32>
    %33 = arith.extui %25 : vector<32x128xi1> to vector<32x128xi32>
    %34 = arith.sitofp %33 : vector<32x128xi32> to vector<32x128xf32>
    %c0_9 = arith.constant 0 : index
    %c0_10 = arith.constant 0 : index
    %c0_11 = arith.constant 0 : index
    %35 = vector.load %arg5[%c0_9, %c0_10, %c0_11] : memref<1x1x128xf32, #tpu.memory_space<vmem>>, vector<1x1x128xf32>
    %36 = vector.shape_cast %35 : vector<1x1x128xf32> to vector<1x128xf32>
    %cst_12 = arith.constant dense<0.000000e+00> : vector<128xf32>
    %37 = vector.multi_reduction <add>, %28, %cst_12 [0] : vector<32x128xf32> to vector<128xf32>
    %38 = vector.shape_cast %37 : vector<128xf32> to vector<1x128xf32>
    %39 = arith.addf %36, %38 : vector<1x128xf32>
    %c0_13 = arith.constant 0 : index
    %c0_14 = arith.constant 0 : index
    %c0_15 = arith.constant 0 : index
    %40 = vector.load %arg5[%c0_13, %c0_14, %c0_15] : memref<1x1x128xf32, #tpu.memory_space<vmem>>, vector<1x1x128xf32>
    %41 = vector.shape_cast %40 : vector<1x1x128xf32> to vector<1x128xf32>
    %42 = vector.shape_cast %39 : vector<1x128xf32> to vector<1x1x128xf32>
    tpu.vector_store %arg5[%c0_13, %c0_14, %c0_15], %42 {strides = array<i32>} : memref<1x1x128xf32, #tpu.memory_space<vmem>>, vector<1x1x128xf32>,
    %c0_16 = arith.constant 0 : index
    %c0_17 = arith.constant 0 : index
    %c0_18 = arith.constant 0 : index
    %43 = vector.load %arg6[%c0_16, %c0_17, %c0_18] : memref<1x1x128xf32, #tpu.memory_space<vmem>>, vector<1x1x128xf32>
    %44 = vector.shape_cast %43 : vector<1x1x128xf32> to vector<1x128xf32>
    %cst_19 = arith.constant dense<0.000000e+00> : vector<128xf32>
    %45 = vector.multi_reduction <add>, %32, %cst_19 [0] : vector<32x128xf32> to vector<128xf32>
    %46 = vector.shape_cast %45 : vector<128xf32> to vector<1x128xf32>
    %47 = arith.addf %44, %46 : vector<1x128xf32>
    %c0_20 = arith.constant 0 : index
    %c0_21 = arith.constant 0 : index
    %c0_22 = arith.constant 0 : index
    %48 = vector.load %arg6[%c0_20, %c0_21, %c0_22] : memref<1x1x128xf32, #tpu.memory_space<vmem>>, vector<1x1x128xf32>
    %49 = vector.shape_cast %48 : vector<1x1x128xf32> to vector<1x128xf32>
    %50 = vector.shape_cast %47 : vector<1x128xf32> to vector<1x1x128xf32>
    tpu.vector_store %arg6[%c0_20, %c0_21, %c0_22], %50 {strides = array<i32>} : memref<1x1x128xf32, #tpu.memory_space<vmem>>, vector<1x1x128xf32>,
    %c0_23 = arith.constant 0 : index
    %c0_24 = arith.constant 0 : index
    %c0_25 = arith.constant 0 : index
    %51 = vector.load %arg7[%c0_23, %c0_24, %c0_25] : memref<1x1x128xf32, #tpu.memory_space<vmem>>, vector<1x1x128xf32>
    %52 = vector.shape_cast %51 : vector<1x1x128xf32> to vector<1x128xf32>
    %cst_26 = arith.constant dense<0.000000e+00> : vector<128xf32>
    %53 = vector.multi_reduction <add>, %30, %cst_26 [0] : vector<32x128xf32> to vector<128xf32>
    %54 = vector.shape_cast %53 : vector<128xf32> to vector<1x128xf32>
    %55 = arith.addf %52, %54 : vector<1x128xf32>
    %c0_27 = arith.constant 0 : index
    %c0_28 = arith.constant 0 : index
    %c0_29 = arith.constant 0 : index
    %56 = vector.load %arg7[%c0_27, %c0_28, %c0_29] : memref<1x1x128xf32, #tpu.memory_space<vmem>>, vector<1x1x128xf32>
    %57 = vector.shape_cast %56 : vector<1x1x128xf32> to vector<1x128xf32>
    %58 = vector.shape_cast %55 : vector<1x128xf32> to vector<1x1x128xf32>
    tpu.vector_store %arg7[%c0_27, %c0_28, %c0_29], %58 {strides = array<i32>} : memref<1x1x128xf32, #tpu.memory_space<vmem>>, vector<1x1x128xf32>,
    %c0_30 = arith.constant 0 : index
    %c0_31 = arith.constant 0 : index
    %c0_32 = arith.constant 0 : index
    %59 = vector.load %arg8[%c0_30, %c0_31, %c0_32] : memref<1x1x128xf32, #tpu.memory_space<vmem>>, vector<1x1x128xf32>
    %60 = vector.shape_cast %59 : vector<1x1x128xf32> to vector<1x128xf32>
    %cst_33 = arith.constant dense<0.000000e+00> : vector<128xf32>
    %61 = vector.multi_reduction <add>, %34, %cst_33 [0] : vector<32x128xf32> to vector<128xf32>
    %62 = vector.shape_cast %61 : vector<128xf32> to vector<1x128xf32>
    %63 = arith.addf %60, %62 : vector<1x128xf32>
    %c0_34 = arith.constant 0 : index
    %c0_35 = arith.constant 0 : index
    %c0_36 = arith.constant 0 : index
    %64 = vector.load %arg8[%c0_34, %c0_35, %c0_36] : memref<1x1x128xf32, #tpu.memory_space<vmem>>, vector<1x1x128xf32>
    %65 = vector.shape_cast %64 : vector<1x1x128xf32> to vector<1x128xf32>
    %66 = vector.shape_cast %63 : vector<1x128xf32> to vector<1x1x128xf32>
    tpu.vector_store %arg8[%c0_34, %c0_35, %c0_36], %66 {strides = array<i32>} : memref<1x1x128xf32, #tpu.memory_space<vmem>>, vector<1x1x128xf32>,
    return
  }
  func.func @transform_0(%arg0: i32, %arg1: i32) -> (i32, i32) {
    %c1_i32 = arith.constant 1 : i32
    %0 = arith.muli %arg0, %c1_i32 : i32
    %1 = arith.addi %0, %arg1 : i32
    %c0_i32 = arith.constant 0 : i32
    %2 = arith.minsi %1, %c0_i32 : i32
    %c0_i32_0 = arith.constant 0 : i32
    %c0_i32_1 = arith.constant 0 : i32
    return %2, %c0_i32_0 : i32, i32
  }
  func.func @transform_1(%arg0: i32, %arg1: i32) -> (i32, i32) {
    %c1_i32 = arith.constant 1 : i32
    %0 = arith.muli %arg0, %c1_i32 : i32
    %1 = arith.addi %0, %arg1 : i32
    %c0_i32 = arith.constant 0 : i32
    %2 = arith.minsi %1, %c0_i32 : i32
    %c0_i32_0 = arith.constant 0 : i32
    %c0_i32_1 = arith.constant 0 : i32
    return %2, %c0_i32_0 : i32, i32
  }
  func.func @transform_2(%arg0: i32, %arg1: i32) -> (i32, i32) {
    %c1_i32 = arith.constant 1 : i32
    %0 = arith.muli %arg0, %c1_i32 : i32
    %1 = arith.addi %0, %arg1 : i32
    %c0_i32 = arith.constant 0 : i32
    %2 = arith.minsi %1, %c0_i32 : i32
    %c0_i32_0 = arith.constant 0 : i32
    %c0_i32_1 = arith.constant 0 : i32
    return %2, %c0_i32_0 : i32, i32
  }
  func.func @transform_3(%arg0: i32, %arg1: i32) -> (i32, i32, i32) {
    %c0_i32 = arith.constant 0 : i32
    %c0_i32_0 = arith.constant 0 : i32
    %c0_i32_1 = arith.constant 0 : i32
    return %arg0, %c0_i32, %c0_i32_0 : i32, i32, i32
  }
  func.func @transform_4(%arg0: i32, %arg1: i32) -> (i32, i32, i32) {
    %c0_i32 = arith.constant 0 : i32
    %c0_i32_0 = arith.constant 0 : i32
    %c0_i32_1 = arith.constant 0 : i32
    return %arg0, %c0_i32, %c0_i32_0 : i32, i32, i32
  }
  func.func @transform_5(%arg0: i32, %arg1: i32) -> (i32, i32, i32) {
    %c0_i32 = arith.constant 0 : i32
    %c0_i32_0 = arith.constant 0 : i32
    %c0_i32_1 = arith.constant 0 : i32
    return %arg0, %c0_i32, %c0_i32_0 : i32, i32, i32
  }
  func.func @transform_6(%arg0: i32, %arg1: i32) -> (i32, i32, i32) {
    %c0_i32 = arith.constant 0 : i32
    %c0_i32_0 = arith.constant 0 : i32
    %c0_i32_1 = arith.constant 0 : i32
    return %arg0, %c0_i32, %c0_i32_0 : i32, i32, i32
  }
}

</mosaic_0001>

<bundles_post_ra>
// kernel: tpu_custom_call.1
= control target key start
LH: loop header
LB: loop body
LE: loop exit
PB: predicated region body
PF: predicated region fallthrough
CT: control target
= control target key end

     0   :  { %s1754_s0 = inlined_call_operand.hbm [shape: f32[32,128], index: 0, kind: input, shape index: {}]   ;;  %s1755_s1 = inlined_call_operand.hbm [shape: f32[32,128], index: 1, kind: input, shape index: {}]   ;;  %s1756_s2 = inlined_call_operand.hbm [shape: f32[32,128], index: 2, kind: input, shape index: {}]   ;;  %s1757_s3 = inlined_call_operand.hbm [shape: f32[2,1,128], index: 3, kind: output, shape index: {0}]   ;;  %s1758_s4 = inlined_call_operand.hbm [shape: f32[2,1,128], index: 4, kind: output, shape index: {1}]   ;;  %s1759_s5 = inlined_call_operand.hbm [shape: f32[2,1,128], index: 5, kind: output, shape index: {2}]   ;;  %s1760_s6 = inlined_call_operand.hbm [shape: f32[2,1,128], index: 6, kind: output, shape index: {3}]  }
   0x1   :  { %1772 = sst [smem:[#allocation25_spill]] %s1755_s1 }
   0x2   :  { %12 = vsyncpa [#allocation3], 0 }
   0x3   :  { %14 = vsyncpa [#allocation3 + $0x1], 0 }
   0x4   :  { %15 = vsyncpa [#allocation6], 0 }
   0x5   :  { %17 = vsyncpa [#allocation6 + $0x1], 0 }
   0x6   :  { %18 = vsyncpa [#allocation4], 0 }
   0x7   :  { %20 = vsyncpa [#allocation4 + $0x1], 0 }
   0x8   :  { %21 = vsyncpa [#allocation10], 0 }
   0x9   :  { %23 = vsyncpa [#allocation10 + $0x1], 0 }
   0xa   :  { %24 = vsyncpa [#allocation13], 0 }
   0xb   :  { %26 = vsyncpa [#allocation13 + $0x1], 0  ;;  %s1315_s21 = smov 0   ;;  %s1317_s22 = smov 0  }
   0xc   :  { %s1319_s23 = smov 0   ;;  %s1321_s24 = smov 0  }
   0xd   :  { %s1323_s25 = smov 0   ;;  %s1325_s26 = smov 0  }
   0xe   :  { %s1327_s27 = smov 0   ;;  %s1329_s28 = smov 0  }
   0xf LB: > { %1773 = sst [smem:[#allocation19_spill]] %s1248_s23  ;;  %s1354_s29 = sadd.s32 4294967295, %s1268_s28   ;;  %s1268_s28 = sphi %s1329_s28, %s32_s28   ;;  %s1264_s27 = sphi %s1327_s27, %s1803_s27   ;;  %s1260_s26 = sphi %s1325_s26, %s1802_s26   ;;  %s1256_s25 = sphi %s1323_s25, %s1744_s25   ;;  %s1252_s24 = sphi %s1321_s24, %s1806_s24   ;;  %s1248_s23 = sphi %s1319_s23, %s1801_s23   ;;  %s1244_s22 = sphi %s1317_s22, %s1805_s22   ;;  %s1240_s21 = sphi %s1315_s21, %s1804_s21  }
  0x10   : > { %1774 = sst [smem:[#allocation20_spill]] %s1264_s27  ;;  %s1761_s30 = sadd.s32 4294967294, %s1268_s28  }
  0x11   : > { %1775 = sst [smem:[#allocation21_spill]] %s1268_s28  ;;  %s44_s7 = sadd.s32 1, %s1264_s27 }
  0x12   : > { %p46_p0 = scmp.ge.s32.totalorder %s44_s7, 2  ;;  %p1237_p1 = scmp.ne.s32.totalorder %s1256_s25, 0 }
  0x13   : > { %p65_p2 = scmp.eq.s32.totalorder %s1268_s28, 0  ;;  %p70_p3 = scmp.ne.s32.totalorder %s1256_s25, %s1252_s24 }
  0x14   : > { %s1808_s7 = smov (%p46_p0, %s44_s7), 0  ;;  %p71_p5 = scmp.eq.s32.totalorder %s1354_s29, 0 }
  0x15   : > { %1776 = sst [smem:[#allocation22_spill]] %s1808_s7  ;;  %p1363_p4 = por %p1237_p1, %p65_p2 }
  0x16   : > { %p1368_p6 = por %p71_p5, %p70_p3  ;;  %s144_s10 = ssub.s32 %s1264_s27, %s1808_s7 }
  0x17   : > { %p145_p7 = scmp.eq.s32.totalorder %s144_s10, 0  ;;  %s147_s11 = sadd.s32 1, %s1248_s23 }
  0x18   : > { %s1778_s9 = scalar_select %p1368_p6, 1, 0 }
  0x19   : > { %s1376_s12 = scalar_select %p145_p7, %s1248_s23, %s147_s11  }
  0x1a   : > { %p157_p8 = scmp.ne.s32.totalorder %s1248_s23, %s1244_s22  ;;  %p158_p9 = scmp.eq.s32.totalorder %s1354_s29, 1 }
  0x1b   : > { %1779 = sst [smem:[#allocation23_spill]] %s1376_s12  ;;  %p163_p10 = scmp.ne.s32.totalorder %s1244_s22, %s1240_s21 }
  0x1c   : > { %p164_p11 = scmp.eq.s32.totalorder %s1761_s30, 1  ;;  %p1385_p12 = por %p158_p9, %p157_p8 }
  0x1d   : > { %p902_p1 = scmp.lt.s32.totalorder %s1268_s28, 2  ;;  %s286_s16 = sand.u32 1, %s1268_s28  }
  0x1e   : > { %s1780_s13 = scalar_select %p1385_p12, 1, 0 }
  0x1f   : > { %p1390_p0 = por %p164_p11, %p163_p10  ;;  %p1397_p2 = pnand %p902_p1, %p1363_p4 }
  0x20   : > { %s1270_s17 = smov [#allocation5]   ;;  %s1405_s19 = scalar_lea.sflag [#allocation6], %s286_s16 }
  0x21   : > { %s1781_s14 = scalar_select %p1390_p0, 1, 0 }
  0x22   : > { %s1783_s15 = scalar_select %p1397_p2, 1, 0 }
  0x23   : > { %1782 = sst [smem:[#allocation24_spill]] %s1781_s14  ;;  %s300_s18 = sshll.u32 %s1270_s17, 4  ;;  %s1402_s18 = int_to_ptr.vmem [resolvable:$true] %s300_s18 }
  0x24   : > { %s1784_s1 = sld [smem:[#allocation25_spill]]  ;;  %p1415_p5 = pneg %p1397_p2 }
  0x2a   : > { %s979_s10 = scalar_lea.hbm %s1784_s1, 512 }
  0x2b   : > { %p980_p4 = scmp.ne.s32.totalorder %s1784_s1, %s979_s10  ;;  %p986_p9 = scmp.lt.u32.totalorder %s979_s10, %s979_s10 }
  0x2c   : > { %p988_p10 = scmp.lt.u32.totalorder %s979_s10, %s1784_s1 }
  0x2d   : > { %p982_p7 = pnand %p1415_p5, %p980_p4 }
  0x2e   : > { %p989_p11 = por %p988_p10, %p986_p9 }
  0x2f   : > { %p983_p8 = pneg %p982_p7 }
  0x31   : > { %p990_p1 = pnand %p989_p11, %p983_p8 }
  0x33   : > { %993 = shalt.err (!%p990_p1)
}
  0x34   : > { %s994_s30 = scalar_lea.vmem %s1402_s18, 512  ;;  %s1001_s20 = scalar_lea.vmem %s1402_s18, 1024 }
  0x35   : > { %p995_p13 = scmp.ne.s32.totalorder %s1402_s18, %s994_s30  ;;  %p1002_p4 = scmp.lt.s32.totalorder %s1402_s18, %s1402_s18 }
  0x36   : > { %p1003_p7 = scmp.lt.s32.totalorder %s1001_s20, %s994_s30 }
  0x37   : > { %p997_p3 = pnand %p995_p13, %p1415_p5 }
  0x38   : > { %p1004_p12 = por %p1003_p7, %p1002_p4 }
  0x39   : > { %p998_p0 = pneg %p997_p3 }
  0x3b   : > { %p1005_p6 = pnand %p1004_p12, %p998_p0 }
  0x3d   : > { %1008 = shalt.err (!%p1005_p6)
}
  0x3e   : > { %s1271_s24 = smov 128   ;;  %s1272_s10 = smov 8  }
  0x3f   : > { %885 = dma.hbm_to_vmem [thread:$0]  (!%p1397_p2), %s1784_s1, 512, %s1402_s18, %s1405_s19, %s1271_s24, %s1271_s24, %s1272_s10  }
  0x40   : > { %p332_p13 = scmp.lt.s32.totalorder %s1268_s28, 3  ;;  %p1786_p3 = scmp.ge.s32.totalorder %s1268_s28, 1 }
  0x41   : > { %s1273_s30 = smov [#allocation2]   ;;  %s1009_s12 = scalar_lea.hbm %s1754_s0, 512 }
  0x42   : > { %p1444_p12 = pnand %p1786_p3, %p332_p13  ;;  %s276_s20 = sshll.u32 %s1273_s30, 4  ;;  %s277_s20 = int_to_ptr.vmem [resolvable:$true] %s276_s20 }
  0x43   : > { %p1010_p6 = scmp.ne.s32.totalorder %s1754_s0, %s1009_s12  ;;  %p1016_p9 = scmp.lt.u32.totalorder %s1009_s12, %s1009_s12 }
  0x44   : > { %s1787_s17 = scalar_select %p1444_p12, 1, 0 }
  0x45   : > { %p1012_p0 = pnand %p1010_p6, %p1415_p5  ;;  %p1018_p10 = scmp.lt.u32.totalorder %s1009_s12, %s1754_s0 }
  0x47   : > { %p1013_p8 = pneg %p1012_p0  ;;  %p1019_p11 = por %p1018_p10, %p1016_p9 }
  0x49   : > { %p1020_p1 = pnand %p1019_p11, %p1013_p8 }
  0x4b   : > { %1023 = shalt.err (!%p1020_p1)
}
  0x4c   : > { %s1024_s16 = scalar_lea.vmem %s277_s20, 512  ;;  %s1031_s27 = scalar_lea.vmem %s277_s20, 1024 }
  0x4d   : > { %p1025_p4 = scmp.ne.s32.totalorder %s277_s20, %s1024_s16  ;;  %p1032_p3 = scmp.lt.s32.totalorder %s277_s20, %s277_s20 }
  0x4e   : > { %p1033_p12 = scmp.lt.s32.totalorder %s1031_s27, %s1024_s16 }
  0x4f   : > { %p1027_p7 = pnand %p1025_p4, %p1415_p5 }
  0x50   : > { %p1034_p2 = por %p1033_p12, %p1032_p3 }
  0x51   : > { %p1028_p13 = pneg %p1027_p7 }
  0x53   : > { %p1035_p6 = pnand %p1034_p2, %p1028_p13 }
  0x55   : > { %1038 = shalt.err (!%p1035_p6)
}
  0x56   : > { %p1788_p0 = scmp.ne.s32.totalorder %s1783_s15, 0  ;;  %s1274_s12 = smov [#allocation7]  }
  0x57   : > { %s324_s14 = sshll.u32 %s1274_s12, 4  ;;  %s1039_s11 = scalar_lea.hbm %s1756_s2, 512  ;;  %s325_s14 = int_to_ptr.vmem [resolvable:$true] %s324_s14 }
  0x58   : > { %882 = dma.hbm_to_vmem [thread:$0]  (!%p1788_p0), %s1754_s0, 512, %s277_s20, [#allocation3], %s1271_s24, %s1271_s24, %s1272_s10  }
  0x59   : > { %p1040_p2 = scmp.ne.s32.totalorder %s1756_s2, %s1039_s11  ;;  %p1046_p9 = scmp.lt.u32.totalorder %s1039_s11, %s1039_s11 }
  0x5a   : > { %p1048_p10 = scmp.lt.u32.totalorder %s1039_s11, %s1756_s2 }
  0x5b   : > { %p1042_p12 = pnand %p1040_p2, %p1415_p5 }
  0x5c   : > { %p1049_p11 = por %p1048_p10, %p1046_p9 }
  0x5d   : > { %p1043_p8 = pneg %p1042_p12 }
  0x5f   : > { %p1050_p1 = pnand %p1049_p11, %p1043_p8 }
  0x61   : > { %1053 = shalt.err (!%p1050_p1)
}
  0x62   : > { %s1054_s20 = scalar_lea.vmem %s325_s14, 512  ;;  %s1061_s23 = scalar_lea.vmem %s325_s14, 1024 }
  0x63   : > { %p1055_p4 = scmp.ne.s32.totalorder %s325_s14, %s1054_s20  ;;  %p1062_p3 = scmp.lt.s32.totalorder %s325_s14, %s325_s14 }
  0x64   : > { %p1063_p6 = scmp.lt.s32.totalorder %s1061_s23, %s1054_s20 }
  0x65   : > { %p1057_p7 = pnand %p1055_p4, %p1415_p5 }
  0x66   : > { %p1064_p0 = por %p1063_p6, %p1062_p3 }
  0x67   : > { %p1058_p13 = pneg %p1057_p7 }
  0x69   : > { %p1065_p2 = pnand %p1064_p0, %p1058_p13 }
  0x6b   : > { %1068 = shalt.err (!%p1065_p2)
}
  0x6c   : > { %p1789_p12 = scmp.ne.s32.totalorder %s1783_s15, 0  ;;  %p1790_p8 = scmp.ne.s32.totalorder %s1787_s17, 0 }
  0x6d   : > { %s338_s8 = sand.u32 (!%p1790_p8), 1, %s1256_s25   ;;  %p1791_p5 = scmp.ne.s32.totalorder (!%p1790_p8), %s1778_s9, 0 }
  0x6e   : > { %888 = dma.hbm_to_vmem [thread:$0]  (!%p1789_p12), %s1756_s2, 512, %s325_s14, %s1405_s19, %s1271_s24, %s1271_s24, %s1272_s10  }
  0x6f   : > { %336 = sbr.rel (%p1790_p8) target bundleno = 240 (0xf0), region = 32  ;;  %s1494_s7 = sshll.u32 (!%p1790_p8), %s338_s8, 5 }
  0x70   : > { %s339_s12 = scalar_lea.sflag (!%p1790_p8), [#allocation3], %s338_s8  ;;  %s1497_s30 = scalar_lea.vmem (!%p1790_p8), [#allocation2], %s1494_s7 }
  0x76   : > { %1218 = dma.done.wait (%p1791_p5), %s339_s12, 512  }
  0x77   : > { %1220 = vsyncadd (%p1791_p5), %s339_s12, 4294966784  ;;  %s347_s15 = sand.u32 1, %s1354_s29   ;;  %s1507_s24 = scalar_lea.vmem [#allocation5], %s1494_s7 }
  0x78   : > { %s348_s19 = scalar_lea.sflag [#allocation6], %s347_s15 }
  0x79   : > { %1222 = dma.done.wait (%p1791_p5), %s348_s19, 1024  }
  0x7a   : > { %1224 = vsyncadd (%p1791_p5), %s348_s19, 4294966272  ;;  %s1514_s10 = sand.u32 1, %s1244_s22   ;;  %v458_v0 = vlaneseq  ;;  %v1275_v1 = vmov 0.0   ;;  %s847_s11 = sshll.u32 %s1260_s26, 5  ;;  %v430_v18 = vld [vmem:[%s1497_s30] sm:$0xff]  ;;  %v431_v22 = vld [vmem:[%s1497_s30 + $0x8] sm:$0xff] }
  0x7b   : > { %s1517_s17 = scalar_lea.vmem [#allocation9], %s1514_s10  ;;  %s1522_s14 = scalar_lea.vmem [#allocation8], %s1514_s10  ;;  %v467_v6 = vstv %s847_s11  ;;  %v432_v24 = vld [vmem:[%s1497_s30 + $0x10] sm:$0xff]  ;;  %v433_v25 = vld [vmem:[%s1497_s30 + $0x18] sm:$0xff]  ;;  %v434_v26 = vld [vmem:[%s1507_s24] sm:$0xff] }
  0x7c   : > { %427 = vst [vmem:[%s1517_s17] sm:$0x1] %v1275_v1  ;;  %426 = vst [vmem:[%s1522_s14] sm:$0x1] %v1275_v1  ;;  %v459_v2 = vshrl.u32 %v458_v0, 7  ;;  %s1527_s9 = scalar_lea.vmem [#allocation11], %s1514_s10  ;;  %s1532_s18 = scalar_lea.vmem [#allocation12], %s1514_s10  ;;  %v464_v7 = vand.u32 127, %v458_v0  ;;  %v442_v32 = vsub.f32 %v430_v18, %v434_v26 }
  0x7d   : > { %428 = vst [vmem:[%s1527_s9] sm:$0x1] %v1275_v1  ;;  %429 = vst [vmem:[%s1532_s18] sm:$0x1] %v1275_v1  ;;  %s360_s16 = scalar_lea.vmem [#allocation7], %s1494_s7  ;;  %v435_v29 = vld [vmem:[%s1507_s24 + $0x8] sm:$0xff]  ;;  %v436_v30 = vld [vmem:[%s1507_s24 + $0x10] sm:$0xff]  ;;  %s1583_s27 = sshll.u32 %s1260_s26, 4 }
  0x7e   : > { %v460_v3 = vadd.s32 8, %v459_v2  ;;  %v461_v4 = vadd.s32 16, %v459_v2  ;;  %v462_v5 = vadd.s32 24, %v459_v2  ;;  %v468_v8 = vadd.s32 %v467_v6, %v459_v2  ;;  %v438_v12 = vld [vmem:[%s360_s16] sm:$0xff]  ;;  %v439_v13 = vld [vmem:[%s360_s16 + $0x8] sm:$0xff]  ;;  %v440_v14 = vld [vmem:[%s360_s16 + $0x10] sm:$0xff]  ;;  %s1591_s26 = scalar_lea.hbm %s1758_s4, %s1583_s27 }
  0x7f   : > { %v441_v16 = vld [vmem:[%s360_s16 + $0x18] sm:$0xff]  ;;  %vm450_vm0 = vcmp.eq.f32.partialorder %v438_v12, 1.0  ;;  %vm451_vm1 = vcmp.eq.f32.partialorder %v439_v13, 1.0  ;;  %vm452_vm2 = vcmp.eq.f32.partialorder %v440_v14, 1.0  ;;  %vm454_vm4 = vcmp.eq.f32.partialorder %v438_v12, 0.0  ;;  %s606_s20 = sshll.u32 %s1517_s17, 4  ;;  %s1593_s20 = int_to_ptr.vmem [resolvable:$true] %s606_s20 }
  0x80   : > { %v469_v9 = vadd.s32 %v467_v6, %v460_v3  ;;  %v470_v10 = vadd.s32 %v467_v6, %v461_v4  ;;  %v471_v11 = vadd.s32 %v467_v6, %v462_v5  ;;  %v472_v15 = vmul.u32 128, %v468_v8  ;;  %v437_v31 = vld [vmem:[%s1507_s24 + $0x18] sm:$0xff]  ;;  %s619_s23 = sshll.u32 %s1527_s9, 4  ;;  %s593_s8 = sshll.u32 %s1522_s14, 4  ;;  %s1595_s23 = int_to_ptr.vmem [resolvable:$true] %s619_s23  ;;  %s1637_s8 = int_to_ptr.vmem [resolvable:$true] %s593_s8 }
  0x81   : > { %vm453_vm3 = vcmp.eq.f32.partialorder %v441_v16, 1.0  ;;  %vm455_vm5 = vcmp.eq.f32.partialorder %v439_v13, 0.0  ;;  %v443_v33 = vsub.f32 %v431_v22, %v435_v29  ;;  %v444_v34 = vsub.f32 %v432_v24, %v436_v30  ;;  %s632_s7 = sshll.u32 %s1532_s18, 4  ;;  %s1605_s12 = scalar_lea.sflag [#allocation10], %s347_s15  ;;  %s1654_s7 = int_to_ptr.vmem [resolvable:$true] %s632_s7 }
  0x82   : > { %v473_v17 = vmul.u32 128, %v469_v9  ;;  %v474_v19 = vmul.u32 128, %v470_v10  ;;  %v476_v21 = vadd.s32 %v472_v15, %v464_v7  ;;  %v445_v35 = vsub.f32 %v433_v25, %v437_v31  ;;  %s1069_s30 = scalar_lea.vmem %s1593_s20, 16  ;;  %p1794_p9 = scmp.ne.s32.totalorder %s1780_s13, 0 }
  0x83   : > { %v475_v20 = vmul.u32 128, %v471_v11  ;;  %v446_v37 = vand.u32 2147483647, %v442_v32  ;;  %v447_v39 = vand.u32 2147483647, %v443_v33  ;;  %vm456_vm13 = vcmp.eq.f32.partialorder %v440_v14, 0.0  ;;  %p1070_p0 = scmp.ne.s32.totalorder %s1593_s20, %s1069_s30 }
  0x84   : > { %v477_v23 = vadd.s32 %v473_v17, %v464_v7  ;;  %v478_v27 = vadd.s32 %v474_v19, %v464_v7  ;;  %vm480_vm6 = vcmp.lt.s32.totalorder %v476_v21, 4096  ;;  %v448_v40 = vand.u32 2147483647, %v444_v34  ;;  %v520_v30 = vld [vmem:[%s1522_s14] sm:$0x1]  ;;  %s1276_s19 = smov [#allocation9]  }
  0x85   : > { %v479_v28 = vadd.s32 %v475_v20, %v464_v7  ;;  %vm484_vm8 = vmand %vm480_vm6, %vm450_vm0  ;;  %v449_v43 = vand.u32 2147483647, %v445_v35  ;;  %v492_v44 = vmul.f32 %v446_v37, %v438_v12  ;;  %v493_v46 = vmul.f32 %v447_v39, %v439_v13  ;;  %v544_v33 = vld [vmem:[%s1527_s9] sm:$0x1]  ;;  %p1071_p10 = pnand %p1070_p0, %p1794_p9  ;;  %s1073_s24 = sshll.u32 %s1276_s19, 4  ;;  %s1074_s24 = int_to_ptr.vmem [resolvable:$false] %s1073_s24 }
  0x86   : > { %vm481_vm7 = vcmp.lt.s32.totalorder %v477_v23, 4096  ;;  %vm482_vm9 = vcmp.lt.s32.totalorder %v478_v27, 4096  ;;  %v848_v36 = vsel %vm484_vm8, 1.0, %v1275_v1  ;;  %v494_v47 = vmul.f32 %v448_v40, %v440_v14  ;;  %vm1560_vm0 = vmand %vm480_vm6, %vm454_vm4  ;;  %s1075_s11 = scalar_lea.vmem %s1074_s24, 32  ;;  %p1076_p1 = scmp.lt.s32.totalorder %s1593_s20, %s1074_s24 }
  0x87   : > { %vm483_vm10 = vcmp.lt.s32.totalorder %v479_v28, 4096  ;;  %vm485_vm11 = vmand %vm481_vm7, %vm451_vm1  ;;  %vm457_vm15 = vcmp.eq.f32.partialorder %v441_v16, 0.0  ;;  %v495_v50 = vmul.f32 %v449_v43, %v441_v16  ;;  %v496_v51 = vsel %vm480_vm6, %v492_v44, 0.0  ;;  %p1072_p11 = pneg %p1071_p10  ;;  %p1077_p4 = scmp.lt.s32.totalorder %s1075_s11, %s1069_s30 }
  0x88   : > { %vm486_vm12 = vmand %vm482_vm9, %vm452_vm2  ;;  %v849_v38 = vsel %vm485_vm11, 1.0, %v1275_v1  ;;  %v500_v52 = vsel %vm1560_vm0, %v446_v37, 0.0  ;;  %v497_v53 = vsel %vm481_vm7, %v493_v46, 0.0  ;;  %v498_v54 = vsel %vm482_vm9, %v494_v47, 0.0 }
  0x89   : > { %vm487_vm14 = vmand %vm483_vm10, %vm453_vm3  ;;  %v850_v41 = vsel %vm486_vm12, 1.0, %v1275_v1  ;;  %v533_v42 = vadd.f32 %v849_v38, %v848_v36  ;;  %v852_v56 = vsel %vm1560_vm0, 1.0, %v1275_v1  ;;  %v521_v58 = vadd.f32 %v497_v53, %v496_v51  ;;  %v556_v36 = vld [vmem:[%s1532_s18] sm:$0x1]  ;;  %p1078_p7 = por %p1077_p4, %p1076_p1 }
  0x8a   : > { %v851_v45 = vsel %vm487_vm14, 1.0, %v1275_v1  ;;  %vm489_vm1 = vmand %vm481_vm7, %vm455_vm5  ;;  %v499_v60 = vsel %vm483_vm10, %v495_v50, 0.0 }
  0x8b   : > { %v534_v49 = vadd.f32 %v850_v41, %v533_v42  ;;  %vm490_vm2 = vmand %vm482_vm9, %vm456_vm13  ;;  %v501_v55 = vsel %vm489_vm1, %v447_v39, 0.0  ;;  %v853_v62 = vsel %vm489_vm1, 1.0, %v1275_v1  ;;  %v522_v2 = vadd.f32 %v521_v58, %v498_v54  ;;  %p1079_p13 = pnand %p1078_p7, %p1072_p11 }
  0x8c   : > { %vm491_vm3 = vmand %vm483_vm10, %vm457_vm15  ;;  %v502_v59 = vsel %vm490_vm2, %v448_v40, 0.0  ;;  %v545_v61 = vadd.f32 %v501_v55, %v500_v52  ;;  %v854_v63 = vsel %vm490_vm2, 1.0, %v1275_v1  ;;  %v557_v4 = vadd.f32 %v853_v62, %v852_v56 }
  0x8d   : > { %v535_v57 = vadd.f32 %v851_v45, %v534_v49  ;;  %v503_v3 = vsel %vm491_vm3, %v449_v43, 0.0  ;;  %v855_v6 = vsel %vm491_vm3, 1.0, %v1275_v1  ;;  %v523_v8 = vadd.f32 %v522_v2, %v499_v60  ;;  %v532_v1 = vld [vmem:[%s1517_s17] sm:$0x1] }
  0x8e   : > { %v546_v5 = vadd.f32 %v545_v61, %v502_v59  ;;  %v558_v9 = vadd.f32 %v854_v63, %v557_v4 }
  0x8f   : > { %v536_v0 = vrot.slane %v535_v57, 4  ;;  %v524_v12 = vrot.slane %v523_v8, 4 }
  0x90   : > { %v547_v10 = vadd.f32 %v546_v5, %v503_v3  ;;  %v559_v13 = vadd.f32 %v855_v6, %v558_v9 }
  0x91   : > { %v537_v7 = vadd.f32 %v536_v0, %v535_v57  ;;  %v525_v16 = vadd.f32 %v524_v12, %v523_v8 }
  0x92   : > { %v548_v14 = vrot.slane %v547_v10, 4  ;;  %v560_v17 = vrot.slane %v559_v13, 4 }
  0x93   : > { %v538_v11 = vrot.slane %v537_v7, 2  ;;  %v526_v20 = vrot.slane %v525_v16, 2 }
  0x94   : > { %v549_v18 = vadd.f32 %v548_v14, %v547_v10  ;;  %v561_v21 = vadd.f32 %v560_v17, %v559_v13 }
  0x95   : > { %v539_v15 = vadd.f32 %v538_v11, %v537_v7  ;;  %v527_v24 = vadd.f32 %v526_v20, %v525_v16 }
  0x96   : > { %v550_v22 = vrot.slane %v549_v18, 2  ;;  %v562_v25 = vrot.slane %v561_v21, 2 }
  0x97   : > { %v540_v19 = vrot.slane %v539_v15, 1  ;;  %v528_v28 = vrot.slane %v527_v24, 1 }
  0x98   : > { %v551_v26 = vadd.f32 %v550_v22, %v549_v18  ;;  %v563_v29 = vadd.f32 %v562_v25, %v561_v21 }
  0x99   : > { %v541_v23 = vadd.f32 %v540_v19, %v539_v15  ;;  %v529_v32 = vadd.f32 %v528_v28, %v527_v24 }
  0x9a   : > { %v552_v31 = vrot.slane %v551_v26, 1  ;;  %v564_v34 = vrot.slane %v563_v29, 1 }
  0x9b   : > { %v542_v27 = vadd.f32 %v541_v23, %v532_v1 }
  0x9c   : > { %v553_v35 = vadd.f32 %v552_v31, %v551_v26 }
  0x9d   : > { %543 = vst [vmem:[%s1517_s17] sm:$0x1] %v542_v27 }
  0x9e   : > { %1082 = shalt.err (!%p1079_p13)
}
  0x9f   : > { %s1083_s29 = scalar_lea.hbm %s1591_s26, 16  ;;  %s1087_s16 = scalar_lea.hbm %s1758_s4, 32 }
  0xa0   : > { %p1084_p3 = scmp.ne.s32.totalorder %s1591_s26, %s1083_s29  ;;  %p1088_p12 = scmp.lt.u32.totalorder %s1591_s26, %s1758_s4 }
  0xa1   : > { %p1089_p8 = scmp.lt.u32.totalorder %s1087_s16, %s1083_s29  ;;  %p1091_p0 = scmp.lt.u32.totalorder %s1083_s29, %s1591_s26 }
  0xa2   : > { %p1085_p6 = pnand %p1084_p3, %p1794_p9 }
  0xa3   : > { %p1090_p5 = por %p1089_p8, %p1088_p12 }
  0xa4   : > { %p1086_p2 = pneg %p1085_p6 }
  0xa5   : > { %p1092_p10 = por %p1091_p0, %p1090_p5 }
  0xa7   : > { %p1093_p11 = pnand %p1092_p10, %p1086_p2 }
  0xa9   : > { %1096 = shalt.err (!%p1093_p11)
}
  0xaa   : > { %872 = dma.vmem_to_hbm [thread:$0]  (%p1794_p9), %s1593_s20, 16, %s1591_s26, %s1605_s12   ;;  %v530_v37 = vadd.f32 %v529_v32, %v520_v30  ;;  %v565_v38 = vadd.f32 %v564_v34, %v563_v29  ;;  %v554_v39 = vadd.f32 %v553_v35, %v544_v33 }
  0xab   : > { %s1633_s24 = scalar_lea.hbm %s1757_s3, %s1583_s27  ;;  %s1643_s15 = scalar_lea.hbm %s1759_s5, %s1583_s27 }
  0xac   : > { %s1649_s17 = scalar_lea.hbm %s1760_s6, %s1583_s27  ;;  %531 = vst [vmem:[%s1522_s14] sm:$0x1] %v530_v37  ;;  %v566_v40 = vadd.f32 %v565_v38, %v556_v36  ;;  %555 = vst [vmem:[%s1527_s9] sm:$0x1] %v554_v39  ;;  %s569_s16 = scalar_lea.sflag [#allocation4], %s1514_s10 }
  0xad   : > { %s1097_s1 = scalar_lea.vmem %s1637_s8, 16  ;;  %s1277_s28 = smov [#allocation8]  }
  0xae   : > { %p1098_p1 = scmp.ne.s32.totalorder %s1637_s8, %s1097_s1  ;;  %s1101_s30 = sshll.u32 %s1277_s28, 4  ;;  %s1102_s30 = int_to_ptr.vmem [resolvable:$false] %s1101_s30 }
  0xaf   : > { %s1103_s19 = scalar_lea.vmem %s1102_s30, 32  ;;  %p1104_p13 = scmp.lt.s32.totalorder %s1637_s8, %s1102_s30 }
  0xb0   : > { %p1099_p4 = pnand %p1098_p1, %p1794_p9  ;;  %p1105_p3 = scmp.lt.s32.totalorder %s1103_s19, %s1097_s1 }
  0xb2   : > { %p1100_p7 = pneg %p1099_p4  ;;  %p1106_p6 = por %p1105_p3, %p1104_p13 }
  0xb4   : > { %p1107_p2 = pnand %p1106_p6, %p1100_p7 }
  0xb6   : > { %1110 = shalt.err (!%p1107_p2)
}
  0xb7   : > { %s1111_s14 = scalar_lea.hbm %s1633_s24, 16  ;;  %s1115_s11 = scalar_lea.hbm %s1757_s3, 32 }
  0xb8   : > { %p1112_p12 = scmp.ne.s32.totalorder %s1633_s24, %s1111_s14  ;;  %p1116_p0 = scmp.lt.u32.totalorder %s1633_s24, %s1757_s3 }
  0xb9   : > { %p1117_p10 = scmp.lt.u32.totalorder %s1115_s11, %s1111_s14  ;;  %p1119_p1 = scmp.lt.u32.totalorder %s1111_s14, %s1633_s24 }
  0xba   : > { %p1113_p8 = pnand %p1112_p12, %p1794_p9 }
  0xbb   : > { %p1118_p11 = por %p1117_p10, %p1116_p0 }
  0xbc   : > { %p1114_p5 = pneg %p1113_p8 }
  0xbd   : > { %p1120_p4 = por %p1119_p1, %p1118_p11 }
  0xbf   : > { %p1121_p7 = pnand %p1120_p4, %p1114_p5 }
  0xc1   : > { %1124 = shalt.err (!%p1121_p7)
}
  0xc2   : > { %871 = dma.vmem_to_hbm [thread:$0]  (%p1794_p9), %s1637_s8, 16, %s1633_s24, %s569_s16   ;;  %567 = vst [vmem:[%s1532_s18] sm:$0x1] %v566_v40 }
  0xc3   : > { %s1125_s26 = scalar_lea.vmem %s1595_s23, 16  ;;  %s1278_s1 = smov [#allocation11]  }
  0xc4   : > { %p1126_p13 = scmp.ne.s32.totalorder %s1595_s23, %s1125_s26  ;;  %s1129_s28 = sshll.u32 %s1278_s1, 4  ;;  %s1130_s28 = int_to_ptr.vmem [resolvable:$false] %s1129_s28 }
  0xc5   : > { %s1131_s30 = scalar_lea.vmem %s1130_s28, 32  ;;  %p1132_p2 = scmp.lt.s32.totalorder %s1595_s23, %s1130_s28 }
  0xc6   : > { %p1127_p3 = pnand %p1126_p13, %p1794_p9  ;;  %p1133_p12 = scmp.lt.s32.totalorder %s1131_s30, %s1125_s26 }
  0xc8   : > { %p1128_p6 = pneg %p1127_p3  ;;  %p1134_p8 = por %p1133_p12, %p1132_p2 }
  0xca   : > { %p1135_p5 = pnand %p1134_p8, %p1128_p6 }
  0xcc   : > { %1138 = shalt.err (!%p1135_p5)
}
  0xcd   : > { %s1139_s18 = scalar_lea.hbm %s1643_s15, 16  ;;  %s1143_s16 = scalar_lea.hbm %s1759_s5, 32 }
  0xce   : > { %p1140_p0 = scmp.ne.s32.totalorder %s1643_s15, %s1139_s18  ;;  %p1144_p1 = scmp.lt.u32.totalorder %s1643_s15, %s1759_s5 }
  0xcf   : > { %p1145_p4 = scmp.lt.u32.totalorder %s1143_s16, %s1139_s18  ;;  %p1147_p13 = scmp.lt.u32.totalorder %s1139_s18, %s1643_s15 }
  0xd0   : > { %p1141_p10 = pnand %p1140_p0, %p1794_p9 }
  0xd1   : > { %p1146_p7 = por %p1145_p4, %p1144_p1 }
  0xd2   : > { %p1142_p11 = pneg %p1141_p10 }
  0xd3   : > { %p1148_p3 = por %p1147_p13, %p1146_p7 }
  0xd5   : > { %p1149_p6 = pnand %p1148_p3, %p1142_p11 }
  0xd7   : > { %1152 = shalt.err (!%p1149_p6)
}
  0xd8   : > { %873 = dma.vmem_to_hbm [thread:$0]  (%p1794_p9), %s1595_s23, 16, %s1643_s15, %s1605_s12  }
  0xd9   : > { %s581_s9 = scalar_lea.sflag [#allocation13], %s1514_s10  ;;  %s1153_s27 = scalar_lea.vmem %s1654_s7, 16 }
  0xda   : > { %p1154_p2 = scmp.ne.s32.totalorder %s1654_s7, %s1153_s27  ;;  %s1279_s11 = smov [#allocation12]  }
  0xdb   : > { %s1157_s29 = sshll.u32 %s1279_s11, 4  ;;  %s1158_s29 = int_to_ptr.vmem [resolvable:$false] %s1157_s29 }
  0xdc   : > { %p1155_p12 = pnand %p1154_p2, %p1794_p9  ;;  %s1159_s20 = scalar_lea.vmem %s1158_s29, 32 }
  0xdd   : > { %p1160_p5 = scmp.lt.s32.totalorder %s1654_s7, %s1158_s29  ;;  %p1161_p0 = scmp.lt.s32.totalorder %s1159_s20, %s1153_s27 }
  0xde   : > { %p1156_p8 = pneg %p1155_p12 }
  0xdf   : > { %p1162_p10 = por %p1161_p0, %p1160_p5 }
  0xe1   : > { %p1163_p11 = pnand %p1162_p10, %p1156_p8 }
  0xe3   : > { %1166 = shalt.err (!%p1163_p11)
}
  0xe4   : > { %s1167_s10 = scalar_lea.hbm %s1649_s17, 16  ;;  %s1171_s15 = scalar_lea.hbm %s1760_s6, 32 }
  0xe5   : > { %p1168_p1 = scmp.ne.s32.totalorder %s1649_s17, %s1167_s10  ;;  %p1172_p13 = scmp.lt.u32.totalorder %s1649_s17, %s1760_s6 }
  0xe6   : > { %p1173_p3 = scmp.lt.u32.totalorder %s1171_s15, %s1167_s10  ;;  %p1175_p2 = scmp.lt.u32.totalorder %s1167_s10, %s1649_s17 }
  0xe7   : > { %p1169_p4 = pnand %p1168_p1, %p1794_p9 }
  0xe8   : > { %p1174_p6 = por %p1173_p3, %p1172_p13 }
  0xe9   : > { %p1170_p7 = pneg %p1169_p4 }
  0xea   : > { %p1176_p12 = por %p1175_p2, %p1174_p6 }
  0xec   : > { %p1177_p8 = pnand %p1176_p12, %p1170_p7 }
  0xee   : > { %1180 = shalt.err (!%p1177_p8)
}
  0xef   : > { %874 = dma.vmem_to_hbm [thread:$0]  (%p1794_p9), %s1654_s7, 16, %s1649_s17, %s581_s9  }
  0xf0 PF: > { %s1795_s28 = sld [smem:[#allocation24_spill]]  ;;  %s1796_s30 = sld [smem:[#allocation21_spill]] }
  0xf1   : > { %s644_s18 = sand.u32 1, %s1240_s21  }
  0xf2   : > { %s645_s8 = scalar_lea.sflag [#allocation4], %s644_s18 }
  0xf6   : > { %p1797_p5 = scmp.ne.s32.totalorder %s1795_s28, 0  ;;  %p1798_p0 = scmp.ge.s32.totalorder %s1796_s30, 2 }
  0xf8   : > { %p890_p10 = pnand %p1798_p0, %p1797_p5 }
  0xfa   : > { %1226 = dma.done.wait (!%p890_p10), %s645_s8, 16  }
  0xfb   : > { %1228 = vsyncadd (!%p890_p10), %s645_s8, 4294967280  ;;  %s1799_s24 = sadd.s32 4294967294, %s1796_s30  }
  0xfc   : > { %s652_s16 = sand.u32 1, %s1799_s24  }
  0xfd   : > { %s653_s19 = scalar_lea.sflag [#allocation10], %s652_s16 }
  0xfe   : > { %1230 = dma.done.wait (!%p890_p10), %s653_s19, 32  }
  0xff   : > { %1232 = vsyncadd (!%p890_p10), %s653_s19, 4294967264  ;;  %s669_s13 = scalar_lea.sflag [#allocation13], %s644_s18 }
 0x100   : > { %1234 = dma.done.wait (!%p890_p10), %s669_s13, 16  }
 0x101   : > { %1236 = vsyncadd (!%p890_p10), %s669_s13, 4294967280  ;;  %s32_s28 = sadd.s32 1, %s1796_s30   ;;  %s1800_s7 = sld [smem:[#allocation19_spill]] }
 0x102   : > { %p29_p9 = scmp.ge.s32.totalorder %s32_s28, 4   ;;  %s1801_s23 = sld [smem:[#allocation23_spill]] }
 0x103   : > { %s1802_s26 = sld [smem:[#allocation20_spill]]  ;;  %s1803_s27 = sld [smem:[#allocation22_spill]] }
 0x104   : > { %s1804_s21 = smov %s1244_s22  ;;  %s1806_s24 = smov %s1256_s25 }
 0x105   : > { %s1744_s25 = smov 0   ;;  %31 = sbr.rel (!%p29_p9) target bundleno = 15 (0xf), region = 154 }
 0x107   : > { %s1805_s22 = smov %s1800_s7 }
 0x10c   :  { %673 = vsyncpa [#allocation3], 1 }
 0x10d   :  { %675 = vsyncpa [#allocation3 + $0x1], 1 }
 0x10e   :  { %676 = vsyncpa [#allocation6], 1 }
 0x10f   :  { %678 = vsyncpa [#allocation6 + $0x1], 1 }
 0x110   :  { %679 = vsyncpa [#allocation4], 1 }
 0x111   :  { %681 = vsyncpa [#allocation4 + $0x1], 1 }
 0x112   :  { %682 = vsyncpa [#allocation10], 1 }
 0x113   :  { %684 = vsyncpa [#allocation10 + $0x1], 1 }
 0x114   :  { %685 = vsyncpa [#allocation13], 1 }
 0x115   :  { %687 = vsyncpa [#allocation13 + $0x1], 1 }

</bundles_post_ra>
